<compile_context>
chip_gen: v6e
topology: v6e:2x2x1
jax: 0.10.0
libtpu: 0.0.40
codegen_flags: <defaults>
</compile_context>

<pallas_src>
import jax
import jax.numpy as jnp
from jax import lax
from jax.experimental import pallas as pl
from jax.experimental.pallas import tpu as pltpu


def _device_config():
    """(vmem_budget_bytes, vmem_limit_bytes, n_tensorcores) per device kind."""
    kind = ""
    try:
        kind = (jax.devices()[0].device_kind or "").lower()
    except Exception:
        pass
    if "v7" in kind or "7x" in kind:
        # v7x: 2 TensorCores per chip, 64 MiB VMEM per TC -> keep headroom.
        return 32 * 1024 * 1024, 48 * 1024 * 1024, 2
    # v5e / v6e (and default): single TC, 128 MiB physical VMEM; the scoped
    # default is only 16/32 MiB so we set vmem_limit_bytes explicitly.
    return 48 * 1024 * 1024, 64 * 1024 * 1024, 1


def _make_dice_kernel(rows_blk, tile_n, num_k_total, kps, split_k,
                      tail_full, tail_partial, needs_clamp, unroll):
    n_chunks = tile_n // 128
    has_tail = (tail_full != n_chunks) or (tail_partial != 0)

    def kernel(p_ref, t_ref, num_ref, den_ref):
        # p_ref/t_ref: (rows_blk, tile_n) native-dtype tiles.
        # num_ref/den_ref: (1, rows_blk, 128) f32 accumulators, resident
        # across the k (reduction) grid axis.
        s = pl.program_id(0)
        k = pl.program_id(1)

        @pl.when(k == 0)
        def _():
            num_ref[...] = jnp.zeros_like(num_ref)
            den_ref[...] = jnp.zeros_like(den_ref)

        def accumulate(n_full, partial_lanes):
            zeros = jnp.zeros((rows_blk, 128), jnp.float32)

            def body(c, carry):
                num_acc, den_acc = carry
                off = pl.multiple_of(c * 128, 128)
                p = p_ref[:, pl.ds(off, 128)].astype(jnp.float32)
                t = t_ref[:, pl.ds(off, 128)].astype(jnp.float32)
                return num_acc + p * t, den_acc + (p * p + t * t)

            if n_full > 0:
                num_acc, den_acc = lax.fori_loop(
                    0, n_full, body, (zeros, zeros),
                    unroll=max(1, min(unroll, n_full)))
            else:
                num_acc, den_acc = zeros, zeros

            if partial_lanes:
                # Single (possibly garbage-padded) tail chunk: mask before
                # multiplying so OOB NaN/Inf cannot leak into the sums.
                off = n_full * 128
                p = p_ref[:, pl.ds(off, 128)].astype(jnp.float32)
                t = t_ref[:, pl.ds(off, 128)].astype(jnp.float32)
                lane = lax.broadcasted_iota(jnp.int32, (rows_blk, 128), 1)
                valid = lane < partial_lanes
                p = jnp.where(valid, p, 0.0)
                t = jnp.where(valid, t, 0.0)
                num_acc = num_acc + p * t
                den_acc = den_acc + p * p + t * t

            num_ref[...] += num_acc[None]
            den_ref[...] += den_acc[None]

        if (not has_tail) and (not needs_clamp):
            # Fast path: every tile is full and unique -> no masking at all.
            accumulate(n_chunks, 0)
        else:
            tile_idx = s * kps + k if split_k else k
            is_last = tile_idx == (num_k_total - 1)

            not_last = jnp.logical_not(is_last)
            if needs_clamp:
                # Skip duplicated (clamped) tiles entirely.
                not_last = jnp.logical_and(not_last, tile_idx < num_k_total)

            @pl.when(not_last)
            def _():
                accumulate(n_chunks, 0)

            @pl.when(is_last)
            def _():
                accumulate(tail_full, tail_partial)

    return kernel


def soft_dice_loss(predict1, predict2, smooth=1.0):
    assert predict1.shape == predict2.shape, "predict1 & predict2 shape don't match"
    B, C = predict1.shape[:2]
    N = 1
    for d in predict1.shape[2:]:
        N *= d
    rows = B * C

    vmem_budget, vmem_limit, n_cores = _device_config()

    # Free row-major flattening: (B, C, ...) -> (B*C, N). No transpose/cast.
    x = predict1.reshape(rows, N)
    y = predict2.reshape(rows, N)

    # Tiny-N edge case: zero-pad the lane dim to one full 128-lane chunk so
    # the BlockSpec never exceeds the array extent and no masking is needed.
    if N < 128:
        x = jnp.pad(x, ((0, 0), (0, 128 - N)))
        y = jnp.pad(y, ((0, 0), (0, 128 - N)))
        n_work = 128
    else:
        n_work = N

    itemsize = jnp.dtype(predict1.dtype).itemsize

    # --- split choice: only on multi-TensorCore chips (v7x) ---
    split_rows = (n_cores >= 2) and (rows >= 16) and (rows % 16 == 0)
    rows_blk = rows // 2 if split_rows else rows

    # Tile size: 2 inputs x 2 pipeline buffers x rows_blk x tile_n x itemsize
    # must fit the per-core VMEM budget; lanes a multiple of 128.
    max_tile = vmem_budget // (4 * rows_blk * itemsize)
    max_tile = max(128, (max_tile // 128) * 128)
    tile_n = min(max_tile, max(128, (n_work // 128) * 128))

    num_k_total = pl.cdiv(n_work, tile_n)

    split_k = (n_cores >= 2) and (not split_rows) and (num_k_total >= 4)
    n_split = 2 if (split_rows or split_k) else 1
    kps = pl.cdiv(num_k_total, n_split) if split_k else num_k_total
    needs_clamp = split_k and (n_split * kps > num_k_total)

    tail_rem = n_work - (num_k_total - 1) * tile_n
    tail_full = tail_rem // 128
    tail_partial = tail_rem % 128

    # Bound live vregs in the unrolled reduction loop
    # (one 128-lane slice of a row block is rows_blk/8 vregs).
    unroll = max(1, min(8, 128 // max(8, rows_blk)))

    if split_rows:
        in_spec = pl.BlockSpec((rows_blk, tile_n), lambda s, k: (s, k))
    elif needs_clamp:
        in_spec = pl.BlockSpec(
            (rows_blk, tile_n),
            lambda s, k: (0, jnp.minimum(s * kps + k, num_k_total - 1)))
    else:
        in_spec = pl.BlockSpec((rows_blk, tile_n),
                               lambda s, k: (0, s * kps + k))

    out_spec = pl.BlockSpec((1, rows_blk, 128), lambda s, k: (s, 0, 0))

    kernel = _make_dice_kernel(rows_blk, tile_n, num_k_total, kps, split_k,
                               tail_full, tail_partial, needs_clamp, unroll)

    num_p, den_p = pl.pallas_call(
        kernel,
        out_shape=(
            jax.ShapeDtypeStruct((n_split, rows_blk, 128), jnp.float32),
            jax.ShapeDtypeStruct((n_split, rows_blk, 128), jnp.float32),
        ),
        grid_spec=pltpu.PrefetchScalarGridSpec(
            num_scalar_prefetch=0,
            grid=(n_split, kps),
            in_specs=[in_spec, in_spec],
            out_specs=[out_spec, out_spec],
        ),
        compiler_params=pltpu.CompilerParams(
            dimension_semantics=("parallel", "arbitrary"),
            vmem_limit_bytes=vmem_limit),
    )(x, y)

    # Cheap finalization on tiny (n_split, rows_blk, 128) partials.
    if split_rows:
        num = jnp.sum(num_p.reshape(rows, 128), axis=-1)   # (B*C,)
        den = jnp.sum(den_p.reshape(rows, 128), axis=-1)
    else:
        num = jnp.sum(num_p, axis=(0, 2))                   # (B*C,)
        den = jnp.sum(den_p, axis=(0, 2))

    loss = 1.0 - (num + smooth) / (den + smooth)
    # sum_c mean_b(loss) / C == mean over all (b, c)
    return jnp.mean(loss)


def _reference(predict1, predict2, smooth=1.0):
    B, C = predict1.shape[:2]
    p = predict1.reshape(B, C, -1).astype(jnp.float32)
    t = predict2.reshape(B, C, -1).astype(jnp.float32)
    num = jnp.sum(p * t, axis=-1) + smooth            # (B, C)
    den = jnp.sum(p * p + t * t, axis=-1) + smooth    # (B, C)
    loss = 1.0 - num / den
    return jnp.mean(loss)


if __name__ == "__main__":
    key = jax.random.PRNGKey(0)
    k1, k2, k3, k4 = jax.random.split(key, 4)

    # Main case (lane extent a multiple of 128 -> fast unmasked path).
    B, C, T, H, W = 2, 4, 4, 8, 8
    predict1 = jax.random.uniform(k1, (B, C, T, H, W), dtype=jnp.float32)
    predict2 = jax.random.uniform(k2, (B, C, T, H, W), dtype=jnp.float32)
    out = jax.block_until_ready(soft_dice_loss(predict1, predict2))
    ref = _reference(predict1, predict2)
    assert jnp.allclose(out, ref, rtol=1e-5, atol=1e-5), (out, ref)

    # Ragged case (N % 128 != 0 -> exercises the gated tail-mask path).
    p3 = jax.random.uniform(k3, (2, 3, 5, 7, 9), dtype=jnp.float32)
    p4 = jax.random.uniform(k4, (2, 3, 5, 7, 9), dtype=jnp.float32)
    out2 = jax.block_until_ready(soft_dice_loss(p3, p4))
    ref2 = _reference(p3, p4)
    assert jnp.allclose(out2, ref2, rtol=1e-5, atol=1e-5), (out2, ref2)

    print("KERNEL_OK")
</pallas_src>

<mosaic_0001>
module attributes {stable_mosaic.version = 11 : i64} {
  func.func @kernel(%arg0: i32, %arg1: i32, %arg2: memref<8x256xf32, #tpu.memory_space<vmem>>, %arg3: memref<8x256xf32, #tpu.memory_space<vmem>>, %arg4: memref<1x8x128xf32, #tpu.memory_space<vmem>>, %arg5: memref<1x8x128xf32, #tpu.memory_space<vmem>>) attributes {dimension_semantics = [#tpu.dimension_semantics<parallel>, #tpu.dimension_semantics<arbitrary>], iteration_bounds = array<i64: 1, 1>, scalar_prefetch = 0 : i64, scratch_operands = 0 : i64, tpu.core_type = #tpu.core_type<tc>, window_params = [{transform_indices = @transform_0, window_bounds = array<i64: 8, 256>}, {transform_indices = @transform_1, window_bounds = array<i64: 8, 256>}, {transform_indices = @transform_2, window_bounds = array<i64: 1, 8, 128>}, {transform_indices = @transform_3, window_bounds = array<i64: 1, 8, 128>}]} {
    %c0_i32 = arith.constant 0 : i32
    %0 = arith.cmpi eq, %arg1, %c0_i32 : i32
    %1 = arith.extui %0 : i1 to i32
    %c0_i32_0 = arith.constant 0 : i32
    %2 = arith.cmpi ne, %1, %c0_i32_0 : i32
    scf.if %2 {
      %cst_18 = arith.constant 0.000000e+00 : f32
      %36 = vector.broadcast %cst_18 : f32 to vector<1x8x128xf32>
      %c0_19 = arith.constant 0 : index
      %c0_20 = arith.constant 0 : index
      %c0_21 = arith.constant 0 : index
      %37 = vector.load %arg4[%c0_19, %c0_20, %c0_21] : memref<1x8x128xf32, #tpu.memory_space<vmem>>, vector<1x8x128xf32>
      tpu.vector_store %arg4[%c0_19, %c0_20, %c0_21], %36 {strides = array<i32>} : memref<1x8x128xf32, #tpu.memory_space<vmem>>, vector<1x8x128xf32>,
      %cst_22 = arith.constant 0.000000e+00 : f32
      %38 = vector.broadcast %cst_22 : f32 to vector<1x8x128xf32>
      %c0_23 = arith.constant 0 : index
      %c0_24 = arith.constant 0 : index
      %c0_25 = arith.constant 0 : index
      %39 = vector.load %arg5[%c0_23, %c0_24, %c0_25] : memref<1x8x128xf32, #tpu.memory_space<vmem>>, vector<1x8x128xf32>
      tpu.vector_store %arg5[%c0_23, %c0_24, %c0_25], %38 {strides = array<i32>} : memref<1x8x128xf32, #tpu.memory_space<vmem>>, vector<1x8x128xf32>,
    } else {
    }
    %cst = arith.constant 0.000000e+00 : f32
    %3 = vector.broadcast %cst : f32 to vector<8x128xf32>
    %c0_i32_1 = arith.constant 0 : i32
    %c128_i32 = arith.constant 128 : i32
    %4 = arith.muli %c0_i32_1, %c128_i32 : i32
    %5 = tpu.assume_multiple %4, 128 : i32
    %c0 = arith.constant 0 : index
    %6 = arith.index_cast %5 : i32 to index
    %7 = vector.load %arg2[%c0, %6] : memref<8x256xf32, #tpu.memory_space<vmem>>, vector<8x128xf32>
    %c0_2 = arith.constant 0 : index
    %8 = arith.index_cast %5 : i32 to index
    %9 = vector.load %arg3[%c0_2, %8] : memref<8x256xf32, #tpu.memory_space<vmem>>, vector<8x128xf32>
    %10 = arith.mulf %7, %9 : vector<8x128xf32>
    %11 = arith.addf %3, %10 : vector<8x128xf32>
    %12 = arith.mulf %7, %7 : vector<8x128xf32>
    %13 = arith.mulf %9, %9 : vector<8x128xf32>
    %14 = arith.addf %12, %13 : vector<8x128xf32>
    %15 = arith.addf %3, %14 : vector<8x128xf32>
    %c1_i32 = arith.constant 1 : i32
    %c128_i32_3 = arith.constant 128 : i32
    %16 = arith.muli %c1_i32, %c128_i32_3 : i32
    %17 = tpu.assume_multiple %16, 128 : i32
    %c0_4 = arith.constant 0 : index
    %18 = arith.index_cast %17 : i32 to index
    %19 = vector.load %arg2[%c0_4, %18] : memref<8x256xf32, #tpu.memory_space<vmem>>, vector<8x128xf32>
    %c0_5 = arith.constant 0 : index
    %20 = arith.index_cast %17 : i32 to index
    %21 = vector.load %arg3[%c0_5, %20] : memref<8x256xf32, #tpu.memory_space<vmem>>, vector<8x128xf32>
    %22 = arith.mulf %19, %21 : vector<8x128xf32>
    %23 = arith.addf %11, %22 : vector<8x128xf32>
    %24 = arith.mulf %19, %19 : vector<8x128xf32>
    %25 = arith.mulf %21, %21 : vector<8x128xf32>
    %26 = arith.addf %24, %25 : vector<8x128xf32>
    %27 = arith.addf %15, %26 : vector<8x128xf32>
    %c2_i32 = arith.constant 2 : i32
    %c0_6 = arith.constant 0 : index
    %c0_7 = arith.constant 0 : index
    %c0_8 = arith.constant 0 : index
    %28 = vector.load %arg4[%c0_6, %c0_7, %c0_8] : memref<1x8x128xf32, #tpu.memory_space<vmem>>, vector<1x8x128xf32>
    %29 = vector.shape_cast %23 : vector<8x128xf32> to vector<1x8x128xf32>
    %30 = arith.addf %28, %29 : vector<1x8x128xf32>
    %c0_9 = arith.constant 0 : index
    %c0_10 = arith.constant 0 : index
    %c0_11 = arith.constant 0 : index
    %31 = vector.load %arg4[%c0_9, %c0_10, %c0_11] : memref<1x8x128xf32, #tpu.memory_space<vmem>>, vector<1x8x128xf32>
    tpu.vector_store %arg4[%c0_9, %c0_10, %c0_11], %30 {strides = array<i32>} : memref<1x8x128xf32, #tpu.memory_space<vmem>>, vector<1x8x128xf32>,
    %c0_12 = arith.constant 0 : index
    %c0_13 = arith.constant 0 : index
    %c0_14 = arith.constant 0 : index
    %32 = vector.load %arg5[%c0_12, %c0_13, %c0_14] : memref<1x8x128xf32, #tpu.memory_space<vmem>>, vector<1x8x128xf32>
    %33 = vector.shape_cast %27 : vector<8x128xf32> to vector<1x8x128xf32>
    %34 = arith.addf %32, %33 : vector<1x8x128xf32>
    %c0_15 = arith.constant 0 : index
    %c0_16 = arith.constant 0 : index
    %c0_17 = arith.constant 0 : index
    %35 = vector.load %arg5[%c0_15, %c0_16, %c0_17] : memref<1x8x128xf32, #tpu.memory_space<vmem>>, vector<1x8x128xf32>
    tpu.vector_store %arg5[%c0_15, %c0_16, %c0_17], %34 {strides = array<i32>} : memref<1x8x128xf32, #tpu.memory_space<vmem>>, vector<1x8x128xf32>,
    return
  }
  func.func @transform_0(%arg0: i32, %arg1: i32) -> (i32, i32) {
    %c1_i32 = arith.constant 1 : i32
    %0 = arith.muli %arg0, %c1_i32 : i32
    %1 = arith.addi %0, %arg1 : i32
    %c0_i32 = arith.constant 0 : i32
    %c0_i32_0 = arith.constant 0 : i32
    return %c0_i32, %1 : i32, i32
  }
  func.func @transform_1(%arg0: i32, %arg1: i32) -> (i32, i32) {
    %c1_i32 = arith.constant 1 : i32
    %0 = arith.muli %arg0, %c1_i32 : i32
    %1 = arith.addi %0, %arg1 : i32
    %c0_i32 = arith.constant 0 : i32
    %c0_i32_0 = arith.constant 0 : i32
    return %c0_i32, %1 : i32, i32
  }
  func.func @transform_2(%arg0: i32, %arg1: i32) -> (i32, i32, i32) {
    %c0_i32 = arith.constant 0 : i32
    %c0_i32_0 = arith.constant 0 : i32
    %c0_i32_1 = arith.constant 0 : i32
    return %arg0, %c0_i32, %c0_i32_0 : i32, i32, i32
  }
  func.func @transform_3(%arg0: i32, %arg1: i32) -> (i32, i32, i32) {
    %c0_i32 = arith.constant 0 : i32
    %c0_i32_0 = arith.constant 0 : i32
    %c0_i32_1 = arith.constant 0 : i32
    return %arg0, %c0_i32, %c0_i32_0 : i32, i32, i32
  }
}

</mosaic_0001>

<bundles_post_ra>
// kernel: tpu_custom_call.1
= control target key start
LH: loop header
LB: loop body
LE: loop exit
PB: predicated region body
PF: predicated region fallthrough
CT: control target
= control target key end

     0   :  { %9 = vsyncpa [#allocation3], 0  ;;  %s240_s0 = inlined_call_operand.hbm [shape: f32[8,256], index: 0, kind: input, shape index: {}]   ;;  %s241_s1 = inlined_call_operand.hbm [shape: f32[8,256], index: 1, kind: input, shape index: {}]   ;;  %s242_s2 = inlined_call_operand.hbm [shape: f32[1,8,128], index: 2, kind: output, shape index: {0}]   ;;  %s243_s3 = inlined_call_operand.hbm [shape: f32[1,8,128], index: 3, kind: output, shape index: {1}]  }
   0x1   :  { %10 = vsyncpa [#allocation6], 0 }
   0x2   :  { %11 = vsyncpa [#allocation4], 0 }
   0x3   :  { %12 = vsyncpa [#allocation9], 0  ;;  %s204_s12 = smov [#allocation2]   ;;  %s205_s14 = smov [#allocation5]  }
   0x4   :  { %s23_s13 = sshll.u32 %s204_s12, 4  ;;  %s37_s15 = sshll.u32 %s205_s14, 4  ;;  %s24_s13 = int_to_ptr.vmem [resolvable:$true] %s23_s13  ;;  %s38_s15 = int_to_ptr.vmem [resolvable:$true] %s37_s15 }
   0x5   :  { %s124_s16 = scalar_lea.vmem %s24_s13, 256  ;;  %p129_p1 = scmp.lt.s32.totalorder %s24_s13, %s24_s13 }
   0x6   :  { %p125_p0 = scmp.ne.s32.totalorder %s24_s13, %s124_s16  ;;  %p130_p2 = scmp.lt.s32.totalorder %s124_s16, %s124_s16 }
   0x8   :  { %p131_p3 = por %p130_p2, %p129_p1 }
   0xa   :  { %p132_p4 = pnand %p131_p3, %p125_p0 }
   0xc   :  { %135 = shalt.err (!%p132_p4)
}
   0xd   :  { %26 = dma.hbm_to_vmem [thread:$0]  %s240_s0, 256, %s24_s13, [#allocation3]  }
   0xe   :  { %s144_s19 = scalar_lea.vmem %s38_s15, 256  ;;  %p149_p6 = scmp.lt.s32.totalorder %s38_s15, %s38_s15 }
   0xf   :  { %p145_p5 = scmp.ne.s32.totalorder %s38_s15, %s144_s19  ;;  %p150_p7 = scmp.lt.s32.totalorder %s144_s19, %s144_s19 }
  0x11   :  { %p151_p8 = por %p150_p7, %p149_p6 }
  0x13   :  { %p152_p9 = pnand %p151_p8, %p145_p5 }
  0x15   :  { %155 = shalt.err (!%p152_p9)
}
  0x16   :  { %40 = dma.hbm_to_vmem [thread:$0]  %s241_s1, 256, %s38_s15, [#allocation6]  }
  0x17   :  { %196 = dma.done.wait [#allocation3], 256  }
  0x18   :  { %197 = vsyncadd [#allocation3], 4294967040 }
  0x19   :  { %198 = dma.done.wait [#allocation6], 256  }
  0x1a   :  { %199 = vsyncadd [#allocation6], 4294967040  ;;  %v57_v0 = vld [vmem:[#allocation2] sm:$0xff]  ;;  %v58_v1 = vld [vmem:[#allocation5] sm:$0xff]  ;;  %s206_s0 = smov [#allocation7]   ;;  %s207_s1 = smov [#allocation8]  }
  0x1b   :  { %v66_v2 = vld [vmem:[#allocation2 + $0x8] sm:$0xff]  ;;  %v59_v3 = vmul.f32 %v58_v1, %v57_v0  ;;  %v68_v4 = vld [vmem:[#allocation5 + $0x8] sm:$0xff]  ;;  %v61_v5 = vmul.f32 %v57_v0, %v57_v0  ;;  %v62_v6 = vmul.f32 %v58_v1, %v58_v1  ;;  %s87_s22 = sshll.u32 %s206_s0, 4  ;;  %s97_s23 = sshll.u32 %s207_s1, 4  ;;  %s88_s22 = int_to_ptr.vmem [resolvable:$true] %s87_s22  ;;  %s98_s23 = int_to_ptr.vmem [resolvable:$true] %s97_s23 }
  0x1c   :  { %v71_v7 = vmul.f32 %v66_v2, %v66_v2  ;;  %v69_v8 = vmul.f32 %v68_v4, %v66_v2  ;;  %v72_v9 = vmul.f32 %v68_v4, %v68_v4  ;;  %s156_s24 = scalar_lea.vmem %s88_s22, 128  ;;  %p161_p11 = scmp.lt.s32.totalorder %s88_s22, %s88_s22 }
  0x1d   :  { %v63_v10 = vadd.f32 %v62_v6, %v61_v5  ;;  %p157_p10 = scmp.ne.s32.totalorder %s88_s22, %s156_s24  ;;  %p162_p12 = scmp.lt.s32.totalorder %s156_s24, %s156_s24 }
  0x1e   :  { %v70_v11 = vadd.f32 %v69_v8, %v59_v3  ;;  %v73_v12 = vadd.f32 %v72_v9, %v71_v7 }
  0x1f   :  { %p163_p13 = por %p162_p12, %p161_p11 }
  0x20   :  { %v74_v13 = vadd.f32 %v73_v12, %v63_v10  ;;  %77 = vst [vmem:[#allocation7] sm:$0xff] %v70_v11 }
  0x21   :  { %p164_p0 = pnand %p163_p13, %p157_p10 }
  0x23   :  { %167 = shalt.err (!%p164_p0)
}
  0x24   :  { %90 = dma.vmem_to_hbm [thread:$0]  %s88_s22, 128, %s242_s2, [#allocation4]   ;;  %80 = vst [vmem:[#allocation8] sm:$0xff] %v74_v13 }
  0x25   :  { %s176_s27 = scalar_lea.vmem %s98_s23, 128  ;;  %p181_p2 = scmp.lt.s32.totalorder %s98_s23, %s98_s23 }
  0x26   :  { %p177_p1 = scmp.ne.s32.totalorder %s98_s23, %s176_s27  ;;  %p182_p3 = scmp.lt.s32.totalorder %s176_s27, %s176_s27 }
  0x28   :  { %p183_p4 = por %p182_p3, %p181_p2 }
  0x2a   :  { %p184_p5 = pnand %p183_p4, %p177_p1 }
  0x2c   :  { %187 = shalt.err (!%p184_p5)
}
  0x2d   :  { %100 = dma.vmem_to_hbm [thread:$0]  %s98_s23, 128, %s243_s3, [#allocation9]  }
  0x2e   :  { %200 = dma.done.wait [#allocation4], 128  }
  0x2f   :  { %201 = vsyncadd [#allocation4], 4294967168 }
  0x30   :  { %202 = dma.done.wait [#allocation9], 128  }
  0x31   :  { %203 = vsyncadd [#allocation9], 4294967168 }
  0x32   :  { %107 = vsyncpa [#allocation3], 1 }
  0x33   :  { %108 = vsyncpa [#allocation6], 1 }
  0x34   :  { %109 = vsyncpa [#allocation4], 1 }
  0x35   :  { %110 = vsyncpa [#allocation9], 1 }

</bundles_post_ra>
